<compile_context>
chip_gen: v7x
topology: tpu7x:2x2x1
jax: 0.10.0
libtpu: 0.0.40
codegen_flags: <defaults>
</compile_context>

<pallas_src>
import functools

import jax
import jax.numpy as jnp
from jax.experimental import pallas as pl
from jax.experimental.pallas import tpu as pltpu


def _round_up(x: int, m: int) -> int:
    return ((x + m - 1) // m) * m


def _cdiv(a: int, b: int) -> int:
    return -(-a // b)


def portfolio_kernel(tau_ref, wblk_ref, xi_ref, out_ref, *, eta, alpha):
    # tau_ref : SMEM (1,)             f32 scalar parameter
    # wblk_ref: VMEM (lane_w, pack)   block-diagonal softmaxed weights (resident)
    # xi_ref  : VMEM (tile_p, lane_w) lane-packed batch tile (pack samples/row)
    # out_ref : VMEM (tile_p, pack)   per-sample loss
    returns = jnp.dot(                                 # (tile_p, pack), f32 accumulate
        xi_ref[...], wblk_ref[...], preferred_element_type=jnp.float32)
    tau = tau_ref[0]
    cvar = tau + jnp.maximum(-returns - tau, 0.0) * (1.0 / alpha)
    out_ref[...] = (-returns + eta * cvar).astype(out_ref.dtype)


def simple_portfolio_forward(xi, raw_weight, tau, *, risk_aversion, risk_level,
                             tile_rows=8192, input_buffers=2):
    """xi: (B, d), raw_weight: (1, d), tau: scalar array. Returns (B, 1) float32."""
    B, d = xi.shape
    f32 = jnp.float32
    itemsize = jnp.dtype(xi.dtype).itemsize

    # Softmax parametrization of the portfolio weights (hoisted; computed once).
    w = jax.nn.softmax(raw_weight.astype(f32), axis=-1).reshape(d)

    # ---- lane packing ----------------------------------------------------------
    # Pack `pack` samples per 128-lane row. If d doesn't divide 128 (d <= 128),
    # pad the feature dim to the next divisor of 128 (a power of two) with
    # zero-weight columns; for d > 128 fall back to one sample per row.
    if d <= 128:
        d_pad = d if 128 % d == 0 else 1 << (d - 1).bit_length()
        pack = 128 // d_pad
    else:
        d_pad, pack = d, 1
    lane_w = pack * d_pad

    rows = _cdiv(B, pack)            # packed rows in the kernel's view of xi
    b_pack = rows * pack             # B rounded up to the pack boundary
    if b_pack != B or d_pad != d:
        # Small pad only: <= pack-1 extra sample rows and/or zero feature columns.
        # NOTE: padded samples do NOT produce zero loss (they yield
        # eta*(tau + relu(-tau)/alpha)); they are discarded by the final [:B]
        # slice and must never be aggregated before that slice.
        xi = jnp.pad(xi, ((0, b_pack - B), (0, d_pad - d)))
    xi_packed = xi.reshape(rows, lane_w)   # contiguous; zero-copy when no pad ran

    # Block-diagonal weights: (xi_packed @ wblk)[r, j] = <xi[r*pack + j, :], w>.
    w_pad = jnp.pad(w, (0, d_pad - d))
    wblk = jnp.kron(jnp.eye(pack, dtype=f32), w_pad.reshape(d_pad, 1)).astype(xi.dtype)

    # ---- tile sizing -----------------------------------------------------------
    # As large as VMEM comfortably allows (amortize per-step overhead), but with
    # >= 2 (even) grid steps when possible so v7x megacore uses both TensorCores.
    bytes_per_row = lane_w * itemsize
    vmem_rows_cap = max(8, (6 * 1024 * 1024 // bytes_per_row) // 8 * 8)   # ~6 MiB/buf
    tile_cap = max(8, (int(tile_rows) // 8) * 8)
    tile_p = min(tile_cap, vmem_rows_cap, _round_up(rows, 8))
    steps = _cdiv(rows, tile_p)
    if steps % 2 == 1 and rows > 8:
        steps += 1
    tile_p = max(8, _round_up(_cdiv(rows, steps), 8))
    grid = (_cdiv(rows, tile_p),)

    xi_index_map = lambda i: (i, 0)
    if int(input_buffers) == 2:
        xi_spec = pl.BlockSpec((tile_p, lane_w), xi_index_map)
    else:  # optional deeper pipelining sweep for very large, jittery DMA streams
        xi_spec = pl.BlockSpec((tile_p, lane_w), xi_index_map,
                               pipeline_mode=pl.Buffered(int(input_buffers)))

    kernel = functools.partial(
        portfolio_kernel, eta=float(risk_aversion), alpha=float(risk_level))

    out_packed = pl.pallas_call(
        kernel,
        out_shape=jax.ShapeDtypeStruct((rows, pack), f32),
        grid=grid,
        in_specs=[
            pl.BlockSpec(memory_space=pltpu.SMEM),              # tau scalar
            pl.BlockSpec((lane_w, pack), lambda i: (0, 0)),     # weights, stay resident
            xi_spec,                                            # xi batch tiles
        ],
        out_specs=pl.BlockSpec((tile_p, pack), lambda i: (i, 0)),
        compiler_params=pltpu.CompilerParams(
            dimension_semantics=("parallel",),
            vmem_limit_bytes=32 * 1024 * 1024,
        ),
        cost_estimate=pl.CostEstimate(
            flops=2 * rows * lane_w * pack,
            transcendentals=0,
            bytes_accessed=rows * lane_w * itemsize + rows * pack * 4
                           + lane_w * pack * itemsize + 4,
        ),
    )(tau.reshape(1).astype(f32), wblk, xi_packed)

    return out_packed.reshape(rows * pack, 1)[:B]


def simple_portfolio_reference(xi, raw_weight, tau, *, risk_aversion, risk_level):
    w = jax.nn.softmax(raw_weight.astype(jnp.float32), axis=-1)
    returns = xi.astype(jnp.float32) @ w.T
    cvar = tau + jax.nn.relu(-returns - tau) / risk_level
    return -returns + risk_aversion * cvar


if __name__ == "__main__":
    risk_aversion = 0.5    # eta
    risk_level = 0.05      # alpha

    key = jax.random.PRNGKey(0)
    k1, k2, k3, k4 = jax.random.split(key, 4)
    tau = jnp.array(0.0, dtype=jnp.float32)              # nn.Parameter(0.0)

    # Case 1: d divides 128 (pack=8), B multiple of pack, f32.  Default tiles ->
    # grid of 2 steps (megacore split) with a partial last block.
    B1, d1 = 2000, 16
    xi1 = jax.random.normal(k1, (B1, d1), dtype=jnp.float32) * 0.1
    rw1 = jax.random.normal(k2, (1, d1), dtype=jnp.float32)   # nn.Linear(d,1).weight
    out1 = jax.block_until_ready(simple_portfolio_forward(
        xi1, rw1, tau, risk_aversion=risk_aversion, risk_level=risk_level))
    ref1 = simple_portfolio_reference(
        xi1, rw1, tau, risk_aversion=risk_aversion, risk_level=risk_level)
    assert out1.shape == (B1, 1), out1.shape
    assert jnp.allclose(out1, ref1, atol=1e-5, rtol=1e-5)

    # Case 2: d does NOT divide 128 (feature-pad path: d_pad=16, pack=8) and
    # B not a multiple of pack (pack-boundary pad path).
    B2, d2 = 1003, 10
    xi2 = jax.random.normal(k3, (B2, d2), dtype=jnp.float32) * 0.1
    rw2 = jax.random.normal(k4, (1, d2), dtype=jnp.float32)
    out2 = jax.block_until_ready(simple_portfolio_forward(
        xi2, rw2, tau, risk_aversion=risk_aversion, risk_level=risk_level))
    ref2 = simple_portfolio_reference(
        xi2, rw2, tau, risk_aversion=risk_aversion, risk_level=risk_level)
    assert out2.shape == (B2, 1), out2.shape
    assert jnp.allclose(out2, ref2, atol=1e-5, rtol=1e-5)

    # Case 3: bf16 xi stream (halves HBM bytes; MXU accumulates in f32).
    xi3 = xi1.astype(jnp.bfloat16)
    out3 = jax.block_until_ready(simple_portfolio_forward(
        xi3, rw1, tau, risk_aversion=risk_aversion, risk_level=risk_level))
    assert out3.shape == (B1, 1), out3.shape
    assert jnp.allclose(out3, ref1, atol=5e-2, rtol=0.0)

    print("KERNEL_OK")
</pallas_src>

<mosaic_0001>
module attributes {stable_mosaic.version = 11 : i64} {
  func.func @portfolio_kernel(%arg0: i32, %arg1: memref<1xf32, #tpu.memory_space<smem>>, %arg2: memref<128x8xf32, #tpu.memory_space<vmem>>, %arg3: memref<128x128xf32, #tpu.memory_space<vmem>>, %arg4: memref<128x8xf32, #tpu.memory_space<vmem>>) attributes {dimension_semantics = [#tpu.dimension_semantics<parallel>], iteration_bounds = array<i64: 2>, scalar_prefetch = 0 : i64, scratch_operands = 0 : i64, tpu.core_type = #tpu.core_type<tc>, window_params = [{transform_indices = @transform_0, window_bounds = array<i64: 1>}, {pipeline_mode = #tpu.pipeline_mode<synchronous>, transform_indices = @transform_1, window_bounds = array<i64: 128, 8>}, {transform_indices = @transform_2, window_bounds = array<i64: 128, 128>}, {transform_indices = @transform_3, window_bounds = array<i64: 128, 8>}]} {
    %c0 = arith.constant 0 : index
    %c0_0 = arith.constant 0 : index
    %0 = vector.load %arg3[%c0, %c0_0] : memref<128x128xf32, #tpu.memory_space<vmem>>, vector<128x128xf32>
    %c0_1 = arith.constant 0 : index
    %c0_2 = arith.constant 0 : index
    %1 = vector.load %arg2[%c0_1, %c0_2] : memref<128x8xf32, #tpu.memory_space<vmem>>, vector<128x8xf32>
    %cst = arith.constant dense<0.000000e+00> : vector<128x8xf32>
    %2 = tpu.matmul %0, %1, %cst {dimension_numbers = #tpu.dot_dimension_numbers<[1], [0], [0], [1], [0, 0, 1, 1], [], []>} : vector<128x128xf32>, vector<128x8xf32>, vector<128x8xf32> -> vector<128x8xf32>
    %c0_3 = arith.constant 0 : index
    %3 = memref.load %arg1[%c0_3] : memref<1xf32, #tpu.memory_space<smem>>
    %cst_4 = arith.constant 0.000000e+00 : f32
    %4 = vector.broadcast %cst_4 : f32 to vector<128x8xf32>
    %5 = arith.subf %4, %2 : vector<128x8xf32>
    %6 = vector.broadcast %3 : f32 to vector<128x8xf32>
    %7 = arith.subf %5, %6 : vector<128x8xf32>
    %cst_5 = arith.constant 0.000000e+00 : f32
    %8 = vector.broadcast %cst_5 : f32 to vector<128x8xf32>
    %9 = arith.maximumf %7, %8 : vector<128x8xf32>
    %cst_6 = arith.constant 2.000000e+01 : f32
    %10 = vector.broadcast %cst_6 : f32 to vector<128x8xf32>
    %11 = arith.mulf %9, %10 : vector<128x8xf32>
    %12 = vector.broadcast %3 : f32 to vector<128x8xf32>
    %13 = arith.addf %12, %11 : vector<128x8xf32>
    %cst_7 = arith.constant 0.000000e+00 : f32
    %14 = vector.broadcast %cst_7 : f32 to vector<128x8xf32>
    %15 = arith.subf %14, %2 : vector<128x8xf32>
    %cst_8 = arith.constant 5.000000e-01 : f32
    %16 = vector.broadcast %cst_8 : f32 to vector<128x8xf32>
    %17 = arith.mulf %16, %13 : vector<128x8xf32>
    %18 = arith.addf %15, %17 : vector<128x8xf32>
    %c0_9 = arith.constant 0 : index
    %c0_10 = arith.constant 0 : index
    %19 = vector.load %arg4[%c0_9, %c0_10] : memref<128x8xf32, #tpu.memory_space<vmem>>, vector<128x8xf32>
    tpu.vector_store %arg4[%c0_9, %c0_10], %18 {strides = array<i32>} : memref<128x8xf32, #tpu.memory_space<vmem>>, vector<128x8xf32>,
    return
  }
  func.func @transform_0(%arg0: i32) -> i32 {
    %c0_i32 = arith.constant 0 : i32
    %c0_i32_0 = arith.constant 0 : i32
    return %c0_i32 : i32
  }
  func.func @transform_1(%arg0: i32) -> (i32, i32) {
    %c0_i32 = arith.constant 0 : i32
    %c0_i32_0 = arith.constant 0 : i32
    %c0_i32_1 = arith.constant 0 : i32
    return %c0_i32, %c0_i32_0 : i32, i32
  }
  func.func @transform_2(%arg0: i32) -> (i32, i32) {
    %c0_i32 = arith.constant 0 : i32
    %c0_i32_0 = arith.constant 0 : i32
    return %arg0, %c0_i32 : i32, i32
  }
  func.func @transform_3(%arg0: i32) -> (i32, i32) {
    %c0_i32 = arith.constant 0 : i32
    %c0_i32_0 = arith.constant 0 : i32
    return %arg0, %c0_i32 : i32, i32
  }
}

</mosaic_0001>

<bundles_post_ra>
// kernel: tpu_custom_call.1
= control target key start
LH: loop header
LB: loop body
LE: loop exit
PB: predicated region body
PF: predicated region fallthrough
CT: control target
= control target key end

     0   :  { %s1132_s0 = inlined_call_operand.<no memory space> [shape: f32[1], index: 0, kind: input, shape index: {}]   ;;  %s1133_s1 = inlined_call_operand.vmem [shape: f32[128,8], index: 1, kind: input, shape index: {}]   ;;  %s1134_s2 = inlined_call_operand.hbm [shape: f32[250,128], index: 2, kind: input, shape index: {}]   ;;  %s1135_s3 = inlined_call_operand.vmem [shape: f32[250,8], index: 3, kind: output, shape index: {}]  }
   0x1   :  { %8 = sst [smem:[#allocation2]] %s1132_s0 }
   0x2   :  { %9 = vsyncpa [#allocation4], 0 }
   0x3   :  { %11 = vsyncpa [#allocation4 + $0x1], 0  ;;  %s852_s14 = smov 0   ;;  %s854_s15 = smov 0  }
   0x4   :  { %s856_s16 = smov 0   ;;  %s858_s17 = smov 0  }
   0x5 LB: > { %s569_s0 = sadd.s32 4294967295, %s824_s17   ;;  %s872_s18 = sadd.s32 1, %s824_s17   ;;  %s824_s17 = sphi %s858_s17, %s1142_s17   ;;  %s820_s16 = sphi %s856_s16, %s1141_s16   ;;  %s816_s15 = sphi %s854_s15, %s1140_s15   ;;  %s812_s14 = sphi %s852_s14, %s1139_s14  }
   0x6   : > { %s63_s19 = ssub.s32 %s824_s17, %s872_s18  ;;  %s66_s20 = sadd.s32 1, %s820_s16 }
   0x7   : > { %p64_p0 = scmp.eq.s32.totalorder %s63_s19, 0  ;;  %p73_p1 = scmp.ne.s32.totalorder %s820_s16, %s816_s15 }
   0x8   : > { %p74_p2 = scmp.eq.s32.totalorder %s824_s17, 0  ;;  %p79_p3 = scmp.ne.s32.totalorder %s816_s15, %s812_s14 }
   0x9   : > { %s882_s21 = scalar_select %p64_p0, %s820_s16, %s66_s20  }
   0xa   : > { %p75_p4 = por %p74_p2, %p73_p1  ;;  %p80_p5 = scmp.eq.s32.totalorder %s569_s0, 0 }
   0xb   : > { %p725_p6 = scmp.lt.s32.totalorder %s824_s17, 2  ;;  %s135_s23 = sand.u32 1, %s820_s16  }
   0xc   : > { %p887_p7 = por %p80_p5, %p79_p3  ;;  %s573_s24 = sshll.u32 %s135_s23, 7 }
   0xd   : > { %s582_s25 = sshll.u32 %s824_s17, 11  ;;  %s139_s29 = scalar_lea.vmem [#allocation3], %s573_s24 }
   0xe   : > { %s896_s28 = scalar_lea.hbm %s1134_s2, %s582_s25  ;;  %s146_s30 = sshll.u32 %s139_s29, 4  ;;  %s898_s30 = int_to_ptr.vmem [resolvable:$true] %s146_s30 }
   0xf   : > { %p900_p8 = pnand %p725_p6, %p75_p4  ;;  %s905_s5 = scalar_lea.sflag [#allocation4], %s135_s23 }
  0x10   : > { %s760_s6 = scalar_lea.hbm %s896_s28, 2048  ;;  %s765_s9 = scalar_lea.hbm %s1134_s2, 4096 }
  0x11   : > { %p761_p10 = scmp.ne.s32.totalorder %s896_s28, %s760_s6  ;;  %p762_p11 = pneg %p900_p8 }
  0x12   : > { %p766_p0 = scmp.lt.u32.totalorder %s896_s28, %s1134_s2  ;;  %p767_p1 = scmp.lt.u32.totalorder %s765_s9, %s760_s6 }
  0x13   : > { %p763_p12 = pnand %p762_p11, %p761_p10  ;;  %p769_p3 = scmp.lt.u32.totalorder %s760_s6, %s896_s28 }
  0x14   : > { %p768_p2 = por %p767_p1, %p766_p0 }
  0x15   : > { %p764_p13 = pneg %p763_p12 }
  0x16   : > { %p770_p4 = por %p769_p3, %p768_p2 }
  0x18   : > { %p771_p5 = pnand %p770_p4, %p764_p13 }
  0x1a   : > { %774 = shalt.err (!%p771_p5)
}
  0x1b   : > { %s775_s12 = scalar_lea.vmem %s898_s30, 2048  ;;  %s826_s13 = smov [#allocation3]  }
  0x1c   : > { %p776_p6 = scmp.ne.s32.totalorder %s898_s30, %s775_s12  ;;  %s780_s14 = sshll.u32 %s826_s13, 4  ;;  %s781_s14 = int_to_ptr.vmem [resolvable:$false] %s780_s14 }
  0x1d   : > { %s782_s19 = scalar_lea.vmem %s781_s14, 4096  ;;  %p783_p9 = scmp.lt.s32.totalorder %s898_s30, %s781_s14 }
  0x1e   : > { %p778_p10 = pnand %p776_p6, %p762_p11  ;;  %p784_p0 = scmp.lt.s32.totalorder %s782_s19, %s775_s12 }
  0x20   : > { %p779_p12 = pneg %p778_p10  ;;  %p785_p1 = por %p784_p0, %p783_p9 }
  0x22   : > { %p786_p2 = pnand %p785_p1, %p779_p12 }
  0x24   : > { %789 = shalt.err (!%p786_p2)
}
  0x25   : > { %s827_s20 = smov 128   ;;  %s828_s23 = smov 8  }
  0x26   : > { %724 = dma.hbm_to_vmem [thread:$0]  (!%p900_p8), %s896_s28, 2048, %s898_s30, %s905_s5, %s827_s20, %s827_s20, %s828_s23  }
  0x27   : > { %p154_p11 = scmp.lt.s32.totalorder %s824_s17, 3  ;;  %p1138_p13 = scmp.ge.s32.totalorder %s824_s17, 1 }
  0x29   : > { %p155_p3 = pnand %p1138_p13, %p154_p11 }
  0x2a   : > { %s160_s24 = sand.u32 (!%p155_p3), 1, %s816_s15  }
  0x2b   : > { %158 = sbr.rel (%p155_p3) target bundleno = 332 (0x14c), region = 32  ;;  %s577_s25 = sshll.u32 (!%p155_p3), %s160_s24, 7 }
  0x2c   : > { %s161_s26 = scalar_lea.sflag (!%p155_p3), [#allocation4], %s160_s24  ;;  %s937_s27 = scalar_lea.vmem (!%p155_p3), [#allocation3], %s577_s25 }
  0x32   : > { %807 = dma.done.wait (%p887_p7), %s161_s26, 2048  }
  0x33   : > { %809 = vsyncadd (%p887_p7), %s161_s26, 4294965248  ;;  %v210_v0 = vld [vmem:[%s1133_s1] sm:$0xff]  ;;  %v211_v1 = vld [vmem:[%s1133_s1 + $0x8] sm:$0xff]  ;;  %s371_s11 = sld [smem:[#allocation2]]  ;;  %s578_s12 = sshll.u32 %s569_s0, 4  ;;  %vm485_vm0 = vcmask 64512  }
  0x34   : > { %v212_v2 = vld [vmem:[%s1133_s1 + $0x10] sm:$0xff]  ;;  %v671_v3 = vpack.c.bf16 %v211_v1, %v210_v0  ;;  %v213_v4 = vld [vmem:[%s1133_s1 + $0x18] sm:$0xff]  ;;  %v214_v6 = vld [vmem:[%s1133_s1 + $0x20] sm:$0xff]  ;;  %p189_p7 = scmp.lt.s32.totalorder %s578_s12, 31 }
  0x35   : > { %v675_v5 = vpack.c.bf16 %v213_v4, %v212_v2  ;;  %v215_v7 = vld [vmem:[%s1133_s1 + $0x28] sm:$0xff]  ;;  %v194_v9 = vld [vmem:[%s937_s27] sm:$0xff]  ;;  %v216_v11 = vld [vmem:[%s1133_s1 + $0x30] sm:$0xff] }
  0x36   : > { %672 = vmatprep.subr.bf16.mxu0 %v671_v3  ;;  %703 = vmatprep.subr.bf16.mxu1 %v671_v3  ;;  %v679_v8 = vpack.c.bf16 %v215_v7, %v214_v6  ;;  %v202_v10 = vld [vmem:[%s937_s27 + $0x40] sm:$0xff]  ;;  %v217_v12 = vld [vmem:[%s1133_s1 + $0x38] sm:$0xff]  ;;  %v219_v15 = vld [vmem:[%s1133_s1 + $0x48] sm:$0xff]  ;;  %s1144_s12 = smov (!%p189_p7, %s578_s12), 31 }
  0x37   : > { %674 = vmatpush3.bf16.msra.mxu0 %v671_v3  ;;  %711 = vmatpush3.bf16.msra.mxu1 %v671_v3  ;;  %v683_v13 = vpack.c.bf16 %v217_v12, %v216_v11  ;;  %v218_v14 = vld [vmem:[%s1133_s1 + $0x40] sm:$0xff]  ;;  %v220_v17 = vld [vmem:[%s1133_s1 + $0x50] sm:$0xff]  ;;  %v221_v18 = vld [vmem:[%s1133_s1 + $0x58] sm:$0xff]  ;;  %s579_s17 = sshll.u32 %s1144_s12, 3 }
  0x38   : > { %676 = vmatprep.subr.bf16.mxu0 %v675_v5  ;;  %704 = vmatprep.subr.bf16.mxu1 %v675_v5  ;;  %v687_v16 = vpack.c.bf16 %v219_v15, %v218_v14  ;;  %v691_v19 = vpack.c.bf16 %v221_v18, %v220_v17  ;;  %v222_v20 = vld [vmem:[%s1133_s1 + $0x60] sm:$0xff]  ;;  %v223_v21 = vld [vmem:[%s1133_s1 + $0x68] sm:$0xff]  ;;  %v224_v23 = vld [vmem:[%s1133_s1 + $0x70] sm:$0xff]  ;;  %s1049_s13 = scalar_lea.vmem %s1135_s3, %s579_s17 }
  0x39   : > { %647 = vmatprep.mubr.f32.mxu0 %v194_v9  ;;  %659 = vmatprep.mubr.f32.mxu1 %v202_v10  ;;  %v695_v22 = vpack.c.bf16 %v223_v21, %v222_v20  ;;  %v225_v24 = vld [vmem:[%s1133_s1 + $0x78] sm:$0xff]  ;;  %v195_v26 = vld [vmem:[%s937_s27 + $0x8] sm:$0xff]  ;;  %v196_v28 = vld [vmem:[%s937_s27 + $0x10] sm:$0xff]  ;;  %v1009_v41 = vstv %s371_s11 }
  0x3a   : > { %v699_v25 = vpack.c.bf16 %v225_v24, %v224_v23  ;;  %v203_v27 = vld [vmem:[%s937_s27 + $0x48] sm:$0xff]  ;;  %v204_v29 = vld [vmem:[%s937_s27 + $0x50] sm:$0xff]  ;;  %v197_v30 = vld [vmem:[%s937_s27 + $0x18] sm:$0xff] }
  0x3b   : > { %678 = vmatpush3.bf16.msra.mxu0 %v675_v5  ;;  %712 = vmatpush3.bf16.msra.mxu1 %v675_v5  ;;  %v205_v31 = vld [vmem:[%s937_s27 + $0x58] sm:$0xff]  ;;  %v198_v32 = vld [vmem:[%s937_s27 + $0x20] sm:$0xff]  ;;  %v199_v34 = vld [vmem:[%s937_s27 + $0x28] sm:$0xff] }
  0x3c   : > { %680 = vmatprep.subr.bf16.mxu0 %v679_v8  ;;  %705 = vmatprep.subr.bf16.mxu1 %v679_v8  ;;  %v206_v33 = vld [vmem:[%s937_s27 + $0x60] sm:$0xff]  ;;  %v207_v35 = vld [vmem:[%s937_s27 + $0x68] sm:$0xff]  ;;  %v200_v36 = vld [vmem:[%s937_s27 + $0x30] sm:$0xff] }
  0x3d   : > { %v208_v37 = vld [vmem:[%s937_s27 + $0x70] sm:$0xff]  ;;  %v201_v38 = vld [vmem:[%s937_s27 + $0x38] sm:$0xff] }
  0x3e   : > { %v209_v39 = vld [vmem:[%s937_s27 + $0x78] sm:$0xff] }
  0x3f   : > { %682 = vmatpush3.bf16.msra.mxu0 %v679_v8  ;;  %713 = vmatpush3.bf16.msra.mxu1 %v679_v8 }
  0x40   : > { %684 = vmatprep.subr.bf16.mxu0 %v683_v13  ;;  %706 = vmatprep.subr.bf16.mxu1 %v683_v13 }
  0x43   : > { %686 = vmatpush3.bf16.msra.mxu0 %v683_v13  ;;  %714 = vmatpush3.bf16.msra.mxu1 %v683_v13 }
  0x44   : > { %688 = vmatprep.subr.bf16.mxu0 %v687_v16  ;;  %707 = vmatprep.subr.bf16.mxu1 %v687_v16 }
  0x47   : > { %690 = vmatpush3.bf16.msra.mxu0 %v687_v16  ;;  %715 = vmatpush3.bf16.msra.mxu1 %v687_v16 }
  0x48   : > { %692 = vmatprep.subr.bf16.mxu0 %v691_v19  ;;  %708 = vmatprep.subr.bf16.mxu1 %v691_v19 }
  0x4b   : > { %694 = vmatpush3.bf16.msra.mxu0 %v691_v19  ;;  %716 = vmatpush3.bf16.msra.mxu1 %v691_v19 }
  0x4c   : > { %696 = vmatprep.subr.bf16.mxu0 %v695_v22  ;;  %709 = vmatprep.subr.bf16.mxu1 %v695_v22 }
  0x4f   : > { %698 = vmatpush3.bf16.msra.mxu0 %v695_v22  ;;  %717 = vmatpush3.bf16.msra.mxu1 %v695_v22 }
  0x50   : > { %700 = vmatprep.subr.bf16.mxu0 %v699_v25  ;;  %710 = vmatprep.subr.bf16.mxu1 %v699_v25 }
  0x53   : > { %702 = vmatpush3.bf16.msra.mxu0 %v699_v25  ;;  %718 = vmatpush3.bf16.msra.mxu1 %v699_v25 }
  0x56   : > { %648 = vmatmul.mubr.f32.vlgmr.msra.gmra.mrb[0].mxu0 %v195_v26  ;;  %660 = vmatmul.mubr.f32.vlgmr.msra.gmra.mrb[0].mxu1 %v203_v27 }
  0x57   : > { %650 = vmatprep.mubr.f32.mxu0 %v196_v28  ;;  %662 = vmatprep.mubr.f32.mxu1 %v204_v29 }
  0x5a   : > { %651 = vmatmul.mubr.f32.gmra.mrb[2].mxu0 %v197_v30  ;;  %663 = vmatmul.mubr.f32.gmra.mrb[2].mxu1 %v205_v31 }
  0x5b   : > { %653 = vmatprep.mubr.f32.mxu0 %v198_v32  ;;  %665 = vmatprep.mubr.f32.mxu1 %v206_v33 }
  0x5e   : > { %654 = vmatmul.mubr.f32.gmra.mrb[4].mxu0 %v199_v34  ;;  %666 = vmatmul.mubr.f32.gmra.mrb[4].mxu1 %v207_v35 }
  0x5f   : > { %656 = vmatprep.mubr.f32.mxu0 %v200_v36  ;;  %668 = vmatprep.mubr.f32.mxu1 %v208_v37 }
  0x62   : > { %657 = vmatmul.mubr.f32.gmra.mrb[6].mxu0 %v201_v38  ;;  %669 = vmatmul.mubr.f32.gmra.mrb[6].mxu1 %v209_v39 }
 0x129   : > { %v649_v40 = vpop.f32.mrb[0].mxu0  ;;  %v661_v42 = vpop.f32.mrb[0].mxu1 }
 0x12a   : > { %v373_v43 = vsub.f32 0.0, %v649_v40  ;;  %v381_v44 = vsub.f32 0.0, %v661_v42  ;;  %v292_v45 = vpop.f32.mrb[1].mxu0  ;;  %v332_v46 = vpop.f32.mrb[1].mxu1 }
 0x12b   : > { %v372_v47 = vsub.f32 0.0, %v292_v45  ;;  %v380_v48 = vsub.f32 0.0, %v332_v46 }
 0x12c   : > { %v390_v49 = vsub.f32 %v373_v43, %v1009_v41  ;;  %v398_v50 = vsub.f32 %v381_v44, %v1009_v41 }
 0x12d   : > { %v389_v51 = vsub.f32 %v372_v47, %v1009_v41  ;;  %v397_v52 = vsub.f32 %v380_v48, %v1009_v41  ;;  %v1017_v53 = vpop.f32.mrb[2].mxu0  ;;  %v1019_v54 = vpop.f32.mrb[2].mxu1 }
 0x12e   : > { %v406_v55 = vmax.f32 %v390_v49, 0.0  ;;  %v414_v56 = vmax.f32 %v398_v50, 0.0  ;;  %v375_v57 = vsub.f32 0.0, %v1017_v53  ;;  %v383_v58 = vsub.f32 0.0, %v1019_v54  ;;  %v1023_v59 = vpop.f32.mrb[3].mxu0  ;;  %v1025_v60 = vpop.f32.mrb[3].mxu1 }
 0x12f   : > { %v405_v61 = vmax.f32 %v389_v51, 0.0  ;;  %v413_v62 = vmax.f32 %v397_v52, 0.0  ;;  %v374_v63 = vsub.f32 0.0, %v1023_v59  ;;  %v382_v0 = vsub.f32 0.0, %v1025_v60 }
 0x130   : > { %v422_v1 = vmul.f32 20.0, %v406_v55  ;;  %v430_v2 = vmul.f32 20.0, %v414_v56  ;;  %v392_v3 = vsub.f32 %v375_v57, %v1009_v41  ;;  %v400_v4 = vsub.f32 %v383_v58, %v1009_v41 }
 0x131   : > { %v421_v5 = vmul.f32 20.0, %v405_v61  ;;  %v429_v6 = vmul.f32 20.0, %v413_v62  ;;  %v391_v7 = vsub.f32 %v374_v63, %v1009_v41  ;;  %v399_v8 = vsub.f32 %v382_v0, %v1009_v41  ;;  %v1033_v9 = vpop.f32.mrb[4].mxu0  ;;  %v1035_v10 = vpop.f32.mrb[4].mxu1 }
 0x132   : > { %v438_v11 = vadd.f32 %v422_v1, %v1009_v41  ;;  %v446_v12 = vadd.f32 %v430_v2, %v1009_v41  ;;  %v408_v13 = vmax.f32 %v392_v3, 0.0  ;;  %v416_v14 = vmax.f32 %v400_v4, 0.0  ;;  %v1040_v15 = vpop.f32.mrb[5].mxu0  ;;  %v1042_v16 = vpop.f32.mrb[5].mxu1 }
 0x133   : > { %v437_v17 = vadd.f32 %v421_v5, %v1009_v41  ;;  %v445_v18 = vadd.f32 %v429_v6, %v1009_v41  ;;  %v407_v19 = vmax.f32 %v391_v7, 0.0  ;;  %v415_v20 = vmax.f32 %v399_v8, 0.0 }
 0x134   : > { %v454_v21 = vmul.f32 0.5, %v438_v11  ;;  %v462_v22 = vmul.f32 0.5, %v446_v12  ;;  %v424_v23 = vmul.f32 20.0, %v408_v13  ;;  %v432_v24 = vmul.f32 20.0, %v416_v14 }
 0x135   : > { %v453_v25 = vmul.f32 0.5, %v437_v17  ;;  %v461_v26 = vmul.f32 0.5, %v445_v18  ;;  %v423_v27 = vmul.f32 20.0, %v407_v19  ;;  %v431_v28 = vmul.f32 20.0, %v415_v20  ;;  %v1051_v29 = vpop.f32.mrb[6].mxu0  ;;  %v1053_v30 = vpop.f32.mrb[6].mxu1 }
 0x136   : > { %v470_v31 = vadd.f32 %v454_v21, %v373_v43  ;;  %v478_v32 = vadd.f32 %v462_v22, %v381_v44  ;;  %v440_v33 = vadd.f32 %v424_v23, %v1009_v41  ;;  %v448_v34 = vadd.f32 %v432_v24, %v1009_v41  ;;  %v1057_v35 = vpop.f32.mrb[7].mxu0  ;;  %v1059_v36 = vpop.f32.mrb[7].mxu1 }
 0x137   : > { %v469_v37 = vadd.f32 %v453_v25, %v372_v47  ;;  %v477_v38 = vadd.f32 %v461_v26, %v380_v48  ;;  %v439_v39 = vadd.f32 %v423_v27, %v1009_v41  ;;  %v447_v40 = vadd.f32 %v431_v28, %v1009_v41 }
 0x138   : > { %487 = vst.msk [vmem:[%s1049_s13 + $0x8] sm:$0xff] %vm485_vm0, %v470_v31  ;;  %495 = vst.msk [vmem:[%s1049_s13 + $0x48] sm:$0xff] %vm485_vm0, %v478_v32  ;;  %v456_v42 = vmul.f32 0.5, %v440_v33  ;;  %v464_v43 = vmul.f32 0.5, %v448_v34  ;;  %v377_v44 = vsub.f32 0.0, %v1033_v9  ;;  %v385_v45 = vsub.f32 0.0, %v1035_v10 }
 0x139   : > { %486 = vst.msk [vmem:[%s1049_s13] sm:$0xff] %vm485_vm0, %v469_v37  ;;  %494 = vst.msk [vmem:[%s1049_s13 + $0x40] sm:$0xff] %vm485_vm0, %v477_v38  ;;  %v455_v46 = vmul.f32 0.5, %v439_v39  ;;  %v463_v47 = vmul.f32 0.5, %v447_v40  ;;  %v376_v48 = vsub.f32 0.0, %v1040_v15  ;;  %v384_v49 = vsub.f32 0.0, %v1042_v16 }
 0x13a   : > { %v472_v50 = vadd.f32 %v456_v42, %v375_v57  ;;  %v480_v51 = vadd.f32 %v464_v43, %v383_v58  ;;  %v394_v52 = vsub.f32 %v377_v44, %v1009_v41  ;;  %v402_v53 = vsub.f32 %v385_v45, %v1009_v41 }
 0x13b   : > { %v471_v54 = vadd.f32 %v455_v46, %v374_v63  ;;  %v479_v55 = vadd.f32 %v463_v47, %v382_v0  ;;  %v393_v56 = vsub.f32 %v376_v48, %v1009_v41  ;;  %v401_v59 = vsub.f32 %v384_v49, %v1009_v41 }
 0x13c   : > { %489 = vst.msk [vmem:[%s1049_s13 + $0x18] sm:$0xff] %vm485_vm0, %v472_v50  ;;  %497 = vst.msk [vmem:[%s1049_s13 + $0x58] sm:$0xff] %vm485_vm0, %v480_v51  ;;  %v410_v60 = vmax.f32 %v394_v52, 0.0  ;;  %v418_v61 = vmax.f32 %v402_v53, 0.0  ;;  %v379_v62 = vsub.f32 0.0, %v1051_v29  ;;  %v387_v57 = vsub.f32 0.0, %v1053_v30 }
 0x13d   : > { %488 = vst.msk [vmem:[%s1049_s13 + $0x10] sm:$0xff] %vm485_vm0, %v471_v54  ;;  %496 = vst.msk [vmem:[%s1049_s13 + $0x50] sm:$0xff] %vm485_vm0, %v479_v55  ;;  %v409_v58 = vmax.f32 %v393_v56, 0.0  ;;  %v417_v63 = vmax.f32 %v401_v59, 0.0  ;;  %v378_v0 = vsub.f32 0.0, %v1057_v35  ;;  %v386_v1 = vsub.f32 0.0, %v1059_v36 }
 0x13e   : > { %v426_v2 = vmul.f32 20.0, %v410_v60  ;;  %v434_v3 = vmul.f32 20.0, %v418_v61  ;;  %v396_v4 = vsub.f32 %v379_v62, %v1009_v41  ;;  %v404_v5 = vsub.f32 %v387_v57, %v1009_v41 }
 0x13f   : > { %v425_v6 = vmul.f32 20.0, %v409_v58  ;;  %v433_v7 = vmul.f32 20.0, %v417_v63  ;;  %v395_v8 = vsub.f32 %v378_v0, %v1009_v41  ;;  %v403_v9 = vsub.f32 %v386_v1, %v1009_v41 }
 0x140   : > { %v442_v10 = vadd.f32 %v426_v2, %v1009_v41  ;;  %v450_v11 = vadd.f32 %v434_v3, %v1009_v41  ;;  %v412_v12 = vmax.f32 %v396_v4, 0.0  ;;  %v420_v13 = vmax.f32 %v404_v5, 0.0 }
 0x141   : > { %v441_v14 = vadd.f32 %v425_v6, %v1009_v41  ;;  %v449_v15 = vadd.f32 %v433_v7, %v1009_v41  ;;  %v411_v16 = vmax.f32 %v395_v8, 0.0  ;;  %v419_v17 = vmax.f32 %v403_v9, 0.0 }
 0x142   : > { %v458_v18 = vmul.f32 0.5, %v442_v10  ;;  %v466_v19 = vmul.f32 0.5, %v450_v11  ;;  %v428_v20 = vmul.f32 20.0, %v412_v12  ;;  %v436_v21 = vmul.f32 20.0, %v420_v13 }
 0x143   : > { %v457_v22 = vmul.f32 0.5, %v441_v14  ;;  %v465_v23 = vmul.f32 0.5, %v449_v15  ;;  %v427_v24 = vmul.f32 20.0, %v411_v16  ;;  %v435_v25 = vmul.f32 20.0, %v419_v17 }
 0x144   : > { %v474_v26 = vadd.f32 %v458_v18, %v377_v44  ;;  %v482_v27 = vadd.f32 %v466_v19, %v385_v45  ;;  %v444_v28 = vadd.f32 %v428_v20, %v1009_v41  ;;  %v452_v29 = vadd.f32 %v436_v21, %v1009_v41 }
 0x145   : > { %v473_v30 = vadd.f32 %v457_v22, %v376_v48  ;;  %v481_v31 = vadd.f32 %v465_v23, %v384_v49  ;;  %v443_v32 = vadd.f32 %v427_v24, %v1009_v41  ;;  %v451_v33 = vadd.f32 %v435_v25, %v1009_v41 }
 0x146   : > { %491 = vst.msk [vmem:[%s1049_s13 + $0x28] sm:$0xff] %vm485_vm0, %v474_v26  ;;  %499 = vst.msk [vmem:[%s1049_s13 + $0x68] sm:$0xff] %vm485_vm0, %v482_v27  ;;  %v460_v34 = vmul.f32 0.5, %v444_v28  ;;  %v468_v35 = vmul.f32 0.5, %v452_v29 }
 0x147   : > { %490 = vst.msk [vmem:[%s1049_s13 + $0x20] sm:$0xff] %vm485_vm0, %v473_v30  ;;  %498 = vst.msk [vmem:[%s1049_s13 + $0x60] sm:$0xff] %vm485_vm0, %v481_v31  ;;  %v459_v36 = vmul.f32 0.5, %v443_v32  ;;  %v467_v37 = vmul.f32 0.5, %v451_v33 }
 0x148   : > { %v476_v38 = vadd.f32 %v460_v34, %v379_v62  ;;  %v484_v39 = vadd.f32 %v468_v35, %v387_v57 }
 0x149   : > { %v475_v40 = vadd.f32 %v459_v36, %v378_v0  ;;  %v483_v42 = vadd.f32 %v467_v37, %v386_v1 }
 0x14a   : > { %493 = vst.msk [vmem:[%s1049_s13 + $0x38] sm:$0xff] %vm485_vm0, %v476_v38  ;;  %501 = vst.msk [vmem:[%s1049_s13 + $0x78] sm:$0xff] %vm485_vm0, %v484_v39 }
 0x14b   : > { %492 = vst.msk [vmem:[%s1049_s13 + $0x30] sm:$0xff] %vm485_vm0, %v475_v40  ;;  %500 = vst.msk [vmem:[%s1049_s13 + $0x70] sm:$0xff] %vm485_vm0, %v483_v42 }
 0x14c PF: > { %p14_p8 = scmp.ge.s32.totalorder %s872_s18, 4   ;;  %s1139_s14 = smov %s816_s15 }
 0x14d   : > { %s1140_s15 = smov %s820_s16  ;;  %s1141_s16 = smov %s882_s21 }
 0x14e   : > { %s1142_s17 = smov %s872_s18  ;;  %16 = sbr.rel (!%p14_p8) target bundleno = 5 (0x5), region = 72 }
 0x155   :  { %524 = vsyncpa [#allocation4], 1 }
 0x156   :  { %526 = vsyncpa [#allocation4 + $0x1], 1 }

</bundles_post_ra>
